<compile_context>
chip_gen: v7x
topology: tpu7x:2x2x1
jax: 0.10.0
libtpu: 0.0.40
codegen_flags: <defaults>
</compile_context>

<pallas_src>
import functools

import jax
import jax.numpy as jnp
from jax.experimental import pallas as pl
from jax.experimental.pallas import tpu as pltpu


def _round_up(x, m):
    return (x + m - 1) // m * m


def _vmem_capacity_bytes():
    """Per-TensorCore VMEM capacity; conservative fallback if the query fails."""
    try:
        return int(pltpu.get_tpu_info().vmem_capacity_bytes)
    except Exception:
        return 64 * 1024 * 1024  # v7x per-TC size: safe lower bound everywhere


def _is_v7x():
    try:
        return "v7" in jax.devices()[0].device_kind.lower()
    except Exception:
        return False


def _supports_buffered():
    if not hasattr(pl, "Buffered"):
        return False
    try:
        pl.BlockSpec((8, 128), lambda i: (0, 0), pipeline_mode=pl.Buffered(1))
        return True
    except TypeError:
        return False


def _resident_spec(shape, single_buffered):
    """BlockSpec for an operand kept resident in VMEM across all grid steps."""
    index_map = lambda i: (0, 0)
    if single_buffered:
        return pl.BlockSpec(shape, index_map, pipeline_mode=pl.Buffered(1))
    # TODO(synk): without pl.Buffered the default pipeline double-buffers this
    # block; switch to memory_space=pl.ANY + a one-time pltpu.make_async_copy into
    # VMEM scratch.  The 2x footprint is accounted for in the VMEM budget below.
    return pl.BlockSpec(shape, index_map)


def _auto_batch_tile(batch, per_row_bytes, act_budget_bytes):
    """Largest multiple-of-8 tile (<=1024 rows) that fits the activation budget.

    Small batches run as a single grid step (no forced >=2-step split: per-step
    overhead is ~0.35 us and with resident weights there is nothing to pipeline).
    """
    b8 = _round_up(batch, 8)
    cap = (act_budget_bytes // max(per_row_bytes, 1)) // 8 * 8
    cap = int(max(8, min(cap, 1024)))
    return b8 if b8 <= cap else cap


def _decoder_kernel(z_ref,
                    w0_ref, b0_ref,
                    w1_ref, b1_ref,
                    w2_ref, b2_ref,
                    w3_ref, b3_ref,
                    out_ref, x_ref):
    """Whole Decoder forward for one batch tile; all weights resident in VMEM.

    z_ref : (tb, embed_p)  (already in the weights' dtype — pre-cast in wrapper)
    w0    : (embed_p, hidden_p)   b0 : (1, hidden_p)
    w1,w2 : (hidden_p, hidden_p)  b1,b2 : (1, hidden_p)   (w2/b2 = last fc1 Linear)
    w3    : (hidden_p, out_p)     b3 : (1, out_p)         (fc2)
    out_ref : (tb, out_p)         x_ref : (tb, hidden_p)

    Matmul operands take the weights' dtype (bf16 fast path or f32);
    accumulation, bias-add and ReLU stay f32 (v5e VPU/EUP have no bf16 path).
    """
    cdt = w0_ref.dtype

    h = jnp.dot(z_ref[...], w0_ref[...], preferred_element_type=jnp.float32)
    h = jnp.maximum(h + b0_ref[...], 0.0)

    h = jnp.dot(h.astype(cdt), w1_ref[...], preferred_element_type=jnp.float32)
    h = jnp.maximum(h + b1_ref[...], 0.0)

    h = jnp.dot(h.astype(cdt), w2_ref[...], preferred_element_type=jnp.float32)
    h = h + b2_ref[...]                       # fc1 ends with a plain Linear

    x = jnp.maximum(h, 0.0)                   # forward(): x = relu(fc1(z))
    x_ref[...] = x.astype(x_ref.dtype)

    out = jnp.dot(x.astype(cdt), w3_ref[...], preferred_element_type=jnp.float32)
    out_ref[...] = (out + b3_ref[...]).astype(out_ref.dtype)


@functools.partial(jax.jit, static_argnames=("batch_tile", "use_bf16", "x_bf16"))
def decoder_forward(z, params, *, batch_tile=None, use_bf16=True, x_bf16=False):
    """Run the Decoder forward as one fused Pallas kernel, tiled over (padded) batch."""
    (w0, b0), (w1, b1), (w2, b2), (w3, b3) = params
    B, embed = z.shape
    hidden = w0.shape[1]
    out_dim = w3.shape[1]

    # Lane-dense padding: all feature / contraction dims -> multiples of 128.
    # (Dims that are already multiples of 256 remain so -> full 256-wide MXU tiles.)
    embed_p = _round_up(embed, 128)
    hidden_p = _round_up(hidden, 128)
    out_p = _round_up(out_dim, 128)

    wdt = jnp.bfloat16 if use_bf16 else jnp.float32
    xdt = jnp.bfloat16 if x_bf16 else jnp.float32
    w_item = jnp.dtype(wdt).itemsize
    x_item = jnp.dtype(xdt).itemsize

    # ---- generation-aware VMEM budget -------------------------------------
    single_buffered = _supports_buffered()
    w_elems = embed_p * hidden_p + 2 * hidden_p * hidden_p + hidden_p * out_p
    w_bytes = w_elems * w_item
    b_bytes = 4 * (3 * hidden_p + out_p)
    weight_buf_factor = 1 if single_buffered else 2
    resident_bytes = weight_buf_factor * w_bytes + 2 * b_bytes

    vmem_cap = _vmem_capacity_bytes()
    vmem_budget = int(0.9 * vmem_cap)
    act_budget = vmem_budget - resident_bytes - (2 << 20)
    if act_budget <= 0:
        # TODO(synk): for hidden sizes whose resident weights exceed this chip's
        # VMEM (e.g. hidden=4096 bf16 on v7x), stream w1/w2 from HBM
        # (memory_space=pl.ANY + pltpu.emit_pipeline over a K/N grid axis marked
        # "arbitrary" with a VMEM f32 accumulator) instead of keeping them resident.
        raise ValueError(
            f"Resident weights ({resident_bytes} B) do not fit the VMEM budget "
            f"({vmem_budget} B on this chip); weight streaming is not implemented.")

    # Per-row activation bytes: double-buffered z/out/x tiles + f32 intermediates.
    per_row = (2 * (embed_p * w_item + out_p * 4 + hidden_p * x_item)
               + 3 * hidden_p * 4 + out_p * 4)

    tb = batch_tile if batch_tile is not None else _auto_batch_tile(B, per_row, act_budget)
    if tb % 8 != 0:
        raise ValueError("batch_tile must be a multiple of 8 (f32 sublane tiling)")
    B_pad = _round_up(B, tb)
    grid_steps = B_pad // tb
    grid = (grid_steps,)

    vmem_limit = int(min(vmem_budget,
                         max(32 * 1024 * 1024,
                             resident_bytes + per_row * tb + (2 << 20))))

    # ---- pad & cast operands (z pre-cast to the matmul operand dtype) ------
    def pad2(a, rows, cols, dtype):
        return jnp.pad(a, ((0, rows - a.shape[0]), (0, cols - a.shape[1]))).astype(dtype)

    z_p = pad2(z, B_pad, embed_p, wdt)
    w0_p, b0_p = pad2(w0, embed_p, hidden_p, wdt), pad2(b0, 1, hidden_p, jnp.float32)
    w1_p, b1_p = pad2(w1, hidden_p, hidden_p, wdt), pad2(b1, 1, hidden_p, jnp.float32)
    w2_p, b2_p = pad2(w2, hidden_p, hidden_p, wdt), pad2(b2, 1, hidden_p, jnp.float32)
    w3_p, b3_p = pad2(w3, hidden_p, out_p, wdt), pad2(b3, 1, out_p, jnp.float32)

    in_specs = [
        pl.BlockSpec((tb, embed_p), lambda i: (i, 0)),                       # z (batch-tiled)
        _resident_spec((embed_p, hidden_p), single_buffered),                # w0
        _resident_spec((1, hidden_p), single_buffered),                      # b0
        _resident_spec((hidden_p, hidden_p), single_buffered),               # w1
        _resident_spec((1, hidden_p), single_buffered),                      # b1
        _resident_spec((hidden_p, hidden_p), single_buffered),               # w2
        _resident_spec((1, hidden_p), single_buffered),                      # b2
        _resident_spec((hidden_p, out_p), single_buffered),                  # w3
        _resident_spec((1, out_p), single_buffered),                         # b3
    ]
    out_specs = [
        pl.BlockSpec((tb, out_p), lambda i: (i, 0)),              # fc2(x)
        pl.BlockSpec((tb, hidden_p), lambda i: (i, 0)),           # x = relu(fc1(z))
    ]
    out_shape = [
        jax.ShapeDtypeStruct((B_pad, out_p), jnp.float32),
        jax.ShapeDtypeStruct((B_pad, hidden_p), xdt),
    ]

    # v7x has 2 TensorCores: only CORE_PARALLEL actually shards the grid across them.
    if grid_steps >= 2 and _is_v7x() and hasattr(pltpu, "CORE_PARALLEL"):
        dim_sem = (pltpu.CORE_PARALLEL,)
    else:
        dim_sem = ("parallel",)

    cost = pl.CostEstimate(
        flops=2 * B_pad * w_elems,
        transcendentals=0,
        bytes_accessed=int(w_bytes + b_bytes
                           + B_pad * (embed_p * w_item + out_p * 4 + hidden_p * x_item)),
    )

    fn = pl.pallas_call(
        _decoder_kernel,
        grid_spec=pltpu.PrefetchScalarGridSpec(
            num_scalar_prefetch=0,
            grid=grid,
            in_specs=in_specs,
            out_specs=out_specs,
        ),
        out_shape=out_shape,
        compiler_params=pltpu.CompilerParams(
            dimension_semantics=dim_sem,
            vmem_limit_bytes=vmem_limit,
        ),
        cost_estimate=cost,
    )
    out_pad, x_pad = fn(z_p, w0_p, b0_p, w1_p, b1_p, w2_p, b2_p, w3_p, b3_p)
    return out_pad[:B, :out_dim], x_pad[:B, :hidden]


def init_decoder_params(key, embed, hidden, out_dim):
    """Init mimicking torch.nn.Linear default (U[-1/sqrt(fan_in), +1/sqrt(fan_in)]).

    Weights stored as [in, out] (transposed from PyTorch's [out, in]).
    """
    def linear(k, fan_in, fan_out):
        kw, kb = jax.random.split(k)
        bound = 1.0 / jnp.sqrt(fan_in)
        w = jax.random.uniform(kw, (fan_in, fan_out), jnp.float32, -bound, bound)
        b = jax.random.uniform(kb, (1, fan_out), jnp.float32, -bound, bound)
        return w, b

    k0, k1, k2, k3 = jax.random.split(key, 4)
    return [
        linear(k0, embed, hidden),    # fc1 layer 0
        linear(k1, hidden, hidden),   # fc1 layer 1
        linear(k2, hidden, hidden),   # fc1 output layer
        linear(k3, hidden, out_dim),  # fc2
    ]


def decoder_reference(z, params, operand_dtype=jnp.float32):
    """Pure-JAX reference matching the PyTorch module semantics.

    operand_dtype lets us mirror the kernel's bf16-operand / f32-accumulate path.
    """
    (w0, b0), (w1, b1), (w2, b2), (w3, b3) = params

    def mm(a, w):
        return jnp.dot(a.astype(operand_dtype), w.astype(operand_dtype),
                       preferred_element_type=jnp.float32)

    h = jax.nn.relu(mm(z, w0) + b0)
    h = jax.nn.relu(mm(h, w1) + b1)
    h = mm(h, w2) + b2            # fc1 ends with a Linear (no activation inside Sequential)
    x = jax.nn.relu(h)            # forward(): x = relu(fc1(z))
    out = mm(x, w3) + b3          # fc2(x)
    return out, x


if __name__ == "__main__":
    key = jax.random.PRNGKey(0)

    # ---- Test 1: small shapes, single grid step (B=16 -> tb=16) ------------
    B, EMBED, HIDDEN, OUT_DIM = 16, 32, 32, 16
    kz, kp, kz2, kp2 = jax.random.split(key, 4)
    z = jax.random.normal(kz, (B, EMBED), dtype=jnp.float32)
    params = init_decoder_params(kp, EMBED, HIDDEN, OUT_DIM)

    # Exact path (f32 MXU operands): tight check against the pure-JAX reference.
    out32, x32 = decoder_forward(z, params, use_bf16=False)
    jax.block_until_ready((out32, x32))
    ref_out, ref_x = decoder_reference(z, params, jnp.float32)
    assert out32.shape == (B, OUT_DIM) and x32.shape == (B, HIDDEN)
    assert jnp.allclose(out32, ref_out, atol=1e-5, rtol=1e-5)
    assert jnp.allclose(x32, ref_x, atol=1e-5, rtol=1e-5)

    # Fast path (bf16 MXU operands, f32 accumulation): the performance default.
    out, x = decoder_forward(z, params, use_bf16=True)
    jax.block_until_ready((out, x))
    ref_out_bf, ref_x_bf = decoder_reference(z, params, jnp.bfloat16)
    assert out.shape == (B, OUT_DIM) and x.shape == (B, HIDDEN)
    assert jnp.allclose(out, ref_out_bf, atol=5e-3, rtol=5e-3)
    assert jnp.allclose(x, ref_x_bf, atol=5e-3, rtol=5e-3)

    # ---- Test 2: multi-step grid (explicit tile) + bf16 x output -----------
    B2, EMBED2, HIDDEN2, OUT2 = 272, 48, 160, 24
    z2 = jax.random.normal(kz2, (B2, EMBED2), dtype=jnp.float32)
    params2 = init_decoder_params(kp2, EMBED2, HIDDEN2, OUT2)
    out2, x2 = decoder_forward(z2, params2, batch_tile=128, use_bf16=True, x_bf16=True)
    jax.block_until_ready((out2, x2))
    ref_out2, ref_x2 = decoder_reference(z2, params2, jnp.bfloat16)
    assert out2.shape == (B2, OUT2) and x2.shape == (B2, HIDDEN2)
    assert jnp.allclose(out2, ref_out2, atol=1e-2, rtol=1e-2)
    assert jnp.allclose(x2.astype(jnp.float32), ref_x2, atol=2e-2, rtol=2e-2)

    print("KERNEL_OK")
</pallas_src>

<mosaic_0001>
module attributes {stable_mosaic.version = 11 : i64} {
  func.func @_decoder_kernel(%arg0: i32, %arg1: memref<16x128xf32, #tpu.memory_space<vmem>>, %arg2: memref<128x128xf32, #tpu.memory_space<vmem>>, %arg3: memref<1x128xf32, #tpu.memory_space<vmem>>, %arg4: memref<128x128xf32, #tpu.memory_space<vmem>>, %arg5: memref<1x128xf32, #tpu.memory_space<vmem>>, %arg6: memref<128x128xf32, #tpu.memory_space<vmem>>, %arg7: memref<1x128xf32, #tpu.memory_space<vmem>>, %arg8: memref<128x128xf32, #tpu.memory_space<vmem>>, %arg9: memref<1x128xf32, #tpu.memory_space<vmem>>, %arg10: memref<16x128xf32, #tpu.memory_space<vmem>>, %arg11: memref<16x128xf32, #tpu.memory_space<vmem>>) attributes {dimension_semantics = [#tpu.dimension_semantics<parallel>], iteration_bounds = array<i64: 1>, scalar_prefetch = 0 : i64, scratch_operands = 0 : i64, tpu.core_type = #tpu.core_type<tc>, window_params = [{transform_indices = @transform_0, window_bounds = array<i64: 16, 128>}, {pipeline_mode = #tpu.pipeline_mode<synchronous>, transform_indices = @transform_1, window_bounds = array<i64: 128, 128>}, {pipeline_mode = #tpu.pipeline_mode<synchronous>, transform_indices = @transform_2, window_bounds = array<i64: 1, 128>}, {pipeline_mode = #tpu.pipeline_mode<synchronous>, transform_indices = @transform_3, window_bounds = array<i64: 128, 128>}, {pipeline_mode = #tpu.pipeline_mode<synchronous>, transform_indices = @transform_4, window_bounds = array<i64: 1, 128>}, {pipeline_mode = #tpu.pipeline_mode<synchronous>, transform_indices = @transform_5, window_bounds = array<i64: 128, 128>}, {pipeline_mode = #tpu.pipeline_mode<synchronous>, transform_indices = @transform_6, window_bounds = array<i64: 1, 128>}, {pipeline_mode = #tpu.pipeline_mode<synchronous>, transform_indices = @transform_7, window_bounds = array<i64: 128, 128>}, {pipeline_mode = #tpu.pipeline_mode<synchronous>, transform_indices = @transform_8, window_bounds = array<i64: 1, 128>}, {transform_indices = @transform_9, window_bounds = array<i64: 16, 128>}, {transform_indices = @transform_10, window_bounds = array<i64: 16, 128>}]} {
    %c0 = arith.constant 0 : index
    %c0_0 = arith.constant 0 : index
    %0 = vector.load %arg1[%c0, %c0_0] : memref<16x128xf32, #tpu.memory_space<vmem>>, vector<16x128xf32>
    %c0_1 = arith.constant 0 : index
    %c0_2 = arith.constant 0 : index
    %1 = vector.load %arg2[%c0_1, %c0_2] : memref<128x128xf32, #tpu.memory_space<vmem>>, vector<128x128xf32>
    %cst = arith.constant dense<0.000000e+00> : vector<16x128xf32>
    %2 = tpu.matmul %0, %1, %cst {dimension_numbers = #tpu.dot_dimension_numbers<[1], [0], [0], [1], [0, 0, 1, 1], [], []>} : vector<16x128xf32>, vector<128x128xf32>, vector<16x128xf32> -> vector<16x128xf32>
    %c0_3 = arith.constant 0 : index
    %c0_4 = arith.constant 0 : index
    %3 = vector.load %arg3[%c0_3, %c0_4] : memref<1x128xf32, #tpu.memory_space<vmem>>, vector<1x128xf32>
    %4 = vector.broadcast %3 : vector<1x128xf32> to vector<16x128xf32>
    %5 = arith.addf %2, %4 : vector<16x128xf32>
    %cst_5 = arith.constant 0.000000e+00 : f32
    %6 = vector.broadcast %cst_5 : f32 to vector<16x128xf32>
    %7 = arith.maximumf %5, %6 : vector<16x128xf32>
    %c0_6 = arith.constant 0 : index
    %c0_7 = arith.constant 0 : index
    %8 = vector.load %arg4[%c0_6, %c0_7] : memref<128x128xf32, #tpu.memory_space<vmem>>, vector<128x128xf32>
    %cst_8 = arith.constant dense<0.000000e+00> : vector<16x128xf32>
    %9 = tpu.matmul %7, %8, %cst_8 {dimension_numbers = #tpu.dot_dimension_numbers<[1], [0], [0], [1], [0, 0, 1, 1], [], []>} : vector<16x128xf32>, vector<128x128xf32>, vector<16x128xf32> -> vector<16x128xf32>
    %c0_9 = arith.constant 0 : index
    %c0_10 = arith.constant 0 : index
    %10 = vector.load %arg5[%c0_9, %c0_10] : memref<1x128xf32, #tpu.memory_space<vmem>>, vector<1x128xf32>
    %11 = vector.broadcast %10 : vector<1x128xf32> to vector<16x128xf32>
    %12 = arith.addf %9, %11 : vector<16x128xf32>
    %cst_11 = arith.constant 0.000000e+00 : f32
    %13 = vector.broadcast %cst_11 : f32 to vector<16x128xf32>
    %14 = arith.maximumf %12, %13 : vector<16x128xf32>
    %c0_12 = arith.constant 0 : index
    %c0_13 = arith.constant 0 : index
    %15 = vector.load %arg6[%c0_12, %c0_13] : memref<128x128xf32, #tpu.memory_space<vmem>>, vector<128x128xf32>
    %cst_14 = arith.constant dense<0.000000e+00> : vector<16x128xf32>
    %16 = tpu.matmul %14, %15, %cst_14 {dimension_numbers = #tpu.dot_dimension_numbers<[1], [0], [0], [1], [0, 0, 1, 1], [], []>} : vector<16x128xf32>, vector<128x128xf32>, vector<16x128xf32> -> vector<16x128xf32>
    %c0_15 = arith.constant 0 : index
    %c0_16 = arith.constant 0 : index
    %17 = vector.load %arg7[%c0_15, %c0_16] : memref<1x128xf32, #tpu.memory_space<vmem>>, vector<1x128xf32>
    %18 = vector.broadcast %17 : vector<1x128xf32> to vector<16x128xf32>
    %19 = arith.addf %16, %18 : vector<16x128xf32>
    %cst_17 = arith.constant 0.000000e+00 : f32
    %20 = vector.broadcast %cst_17 : f32 to vector<16x128xf32>
    %21 = arith.maximumf %19, %20 : vector<16x128xf32>
    %c0_18 = arith.constant 0 : index
    %c0_19 = arith.constant 0 : index
    %22 = vector.load %arg11[%c0_18, %c0_19] : memref<16x128xf32, #tpu.memory_space<vmem>>, vector<16x128xf32>
    tpu.vector_store %arg11[%c0_18, %c0_19], %21 {strides = array<i32>} : memref<16x128xf32, #tpu.memory_space<vmem>>, vector<16x128xf32>,
    %c0_20 = arith.constant 0 : index
    %c0_21 = arith.constant 0 : index
    %23 = vector.load %arg8[%c0_20, %c0_21] : memref<128x128xf32, #tpu.memory_space<vmem>>, vector<128x128xf32>
    %cst_22 = arith.constant dense<0.000000e+00> : vector<16x128xf32>
    %24 = tpu.matmul %21, %23, %cst_22 {dimension_numbers = #tpu.dot_dimension_numbers<[1], [0], [0], [1], [0, 0, 1, 1], [], []>} : vector<16x128xf32>, vector<128x128xf32>, vector<16x128xf32> -> vector<16x128xf32>
    %c0_23 = arith.constant 0 : index
    %c0_24 = arith.constant 0 : index
    %25 = vector.load %arg9[%c0_23, %c0_24] : memref<1x128xf32, #tpu.memory_space<vmem>>, vector<1x128xf32>
    %26 = vector.broadcast %25 : vector<1x128xf32> to vector<16x128xf32>
    %27 = arith.addf %24, %26 : vector<16x128xf32>
    %c0_25 = arith.constant 0 : index
    %c0_26 = arith.constant 0 : index
    %28 = vector.load %arg10[%c0_25, %c0_26] : memref<16x128xf32, #tpu.memory_space<vmem>>, vector<16x128xf32>
    tpu.vector_store %arg10[%c0_25, %c0_26], %27 {strides = array<i32>} : memref<16x128xf32, #tpu.memory_space<vmem>>, vector<16x128xf32>,
    return
  }
  func.func @transform_0(%arg0: i32) -> (i32, i32) {
    %c0_i32 = arith.constant 0 : i32
    %c0_i32_0 = arith.constant 0 : i32
    return %arg0, %c0_i32 : i32, i32
  }
  func.func @transform_1(%arg0: i32) -> (i32, i32) {
    %c0_i32 = arith.constant 0 : i32
    %c0_i32_0 = arith.constant 0 : i32
    %c0_i32_1 = arith.constant 0 : i32
    return %c0_i32, %c0_i32_0 : i32, i32
  }
  func.func @transform_2(%arg0: i32) -> (i32, i32) {
    %c0_i32 = arith.constant 0 : i32
    %c0_i32_0 = arith.constant 0 : i32
    %c0_i32_1 = arith.constant 0 : i32
    return %c0_i32, %c0_i32_0 : i32, i32
  }
  func.func @transform_3(%arg0: i32) -> (i32, i32) {
    %c0_i32 = arith.constant 0 : i32
    %c0_i32_0 = arith.constant 0 : i32
    %c0_i32_1 = arith.constant 0 : i32
    return %c0_i32, %c0_i32_0 : i32, i32
  }
  func.func @transform_4(%arg0: i32) -> (i32, i32) {
    %c0_i32 = arith.constant 0 : i32
    %c0_i32_0 = arith.constant 0 : i32
    %c0_i32_1 = arith.constant 0 : i32
    return %c0_i32, %c0_i32_0 : i32, i32
  }
  func.func @transform_5(%arg0: i32) -> (i32, i32) {
    %c0_i32 = arith.constant 0 : i32
    %c0_i32_0 = arith.constant 0 : i32
    %c0_i32_1 = arith.constant 0 : i32
    return %c0_i32, %c0_i32_0 : i32, i32
  }
  func.func @transform_6(%arg0: i32) -> (i32, i32) {
    %c0_i32 = arith.constant 0 : i32
    %c0_i32_0 = arith.constant 0 : i32
    %c0_i32_1 = arith.constant 0 : i32
    return %c0_i32, %c0_i32_0 : i32, i32
  }
  func.func @transform_7(%arg0: i32) -> (i32, i32) {
    %c0_i32 = arith.constant 0 : i32
    %c0_i32_0 = arith.constant 0 : i32
    %c0_i32_1 = arith.constant 0 : i32
    return %c0_i32, %c0_i32_0 : i32, i32
  }
  func.func @transform_8(%arg0: i32) -> (i32, i32) {
    %c0_i32 = arith.constant 0 : i32
    %c0_i32_0 = arith.constant 0 : i32
    %c0_i32_1 = arith.constant 0 : i32
    return %c0_i32, %c0_i32_0 : i32, i32
  }
  func.func @transform_9(%arg0: i32) -> (i32, i32) {
    %c0_i32 = arith.constant 0 : i32
    %c0_i32_0 = arith.constant 0 : i32
    return %arg0, %c0_i32 : i32, i32
  }
  func.func @transform_10(%arg0: i32) -> (i32, i32) {
    %c0_i32 = arith.constant 0 : i32
    %c0_i32_0 = arith.constant 0 : i32
    return %arg0, %c0_i32 : i32, i32
  }
}

</mosaic_0001>

<bundles_post_ra>
// kernel: decoder_forward.1
= control target key start
LH: loop header
LB: loop body
LE: loop exit
PB: predicated region body
PF: predicated region fallthrough
CT: control target
= control target key end

     0   :  { %16 = vsyncpa [#allocation3], 0  ;;  %s1161_s0 = inlined_call_operand.vmem [shape: f32[16,128], index: 0, kind: input, shape index: {}]   ;;  %s1162_s1 = inlined_call_operand.vmem [shape: f32[128,128], index: 1, kind: input, shape index: {}]   ;;  %s1163_s2 = inlined_call_operand.vmem [shape: f32[1,128], index: 2, kind: input, shape index: {}]   ;;  %s1164_s3 = inlined_call_operand.vmem [shape: f32[128,128], index: 3, kind: input, shape index: {}]   ;;  %s1165_s4 = inlined_call_operand.vmem [shape: f32[1,128], index: 4, kind: input, shape index: {}]   ;;  %s1166_s5 = inlined_call_operand.vmem [shape: f32[128,128], index: 5, kind: input, shape index: {}]   ;;  %s1167_s6 = inlined_call_operand.vmem [shape: f32[1,128], index: 6, kind: input, shape index: {}]   ;;  %s1168_s7 = inlined_call_operand.vmem [shape: f32[128,128], index: 7, kind: input, shape index: {}]   ;;  %s1169_s8 = inlined_call_operand.vmem [shape: f32[1,128], index: 8, kind: input, shape index: {}]   ;;  %s1170_s9 = inlined_call_operand.hbm [shape: f32[16,128], index: 9, kind: output, shape index: {0}]   ;;  %s1171_s10 = inlined_call_operand.hbm [shape: f32[16,128], index: 10, kind: output, shape index: {1}]  }
   0x1   :  { %v38_v0 = vld [vmem:[%s1162_s1] sm:$0xff]  ;;  %v39_v1 = vld [vmem:[%s1162_s1 + $0x8] sm:$0xff]  ;;  %v40_v2 = vld [vmem:[%s1162_s1 + $0x10] sm:$0xff] }
   0x2   :  { %v688_v3 = vpack.c.bf16 %v39_v1, %v38_v0  ;;  %v41_v4 = vld [vmem:[%s1162_s1 + $0x18] sm:$0xff]  ;;  %v42_v6 = vld [vmem:[%s1162_s1 + $0x20] sm:$0xff]  ;;  %v43_v7 = vld [vmem:[%s1162_s1 + $0x28] sm:$0xff] }
   0x3   :  { %v692_v5 = vpack.c.bf16 %v41_v4, %v40_v2  ;;  %v696_v8 = vpack.c.bf16 %v43_v7, %v42_v6  ;;  %v44_v9 = vld [vmem:[%s1162_s1 + $0x30] sm:$0xff]  ;;  %v45_v10 = vld [vmem:[%s1162_s1 + $0x38] sm:$0xff]  ;;  %v36_v11 = vld [vmem:[%s1161_s0] sm:$0xff] }
   0x4   :  { %689 = vmatprep.subr.bf16.mxu0 %v688_v3  ;;  %580 = vmatprep.mubr.f32.mxu0 %v36_v11  ;;  %v138_v12 = vld [vmem:[%s1164_s3] sm:$0xff]  ;;  %v139_v13 = vld [vmem:[%s1164_s3 + $0x8] sm:$0xff]  ;;  %v140_v14 = vld [vmem:[%s1164_s3 + $0x10] sm:$0xff]  ;;  %v700_v20 = vpack.c.bf16 %v45_v10, %v44_v9 }
   0x5   :  { %691 = vmatpush3.bf16.msra.mxu0 %v688_v3  ;;  %v720_v15 = vpack.c.bf16 %v139_v13, %v138_v12  ;;  %v141_v16 = vld [vmem:[%s1164_s3 + $0x18] sm:$0xff]  ;;  %v142_v18 = vld [vmem:[%s1164_s3 + $0x20] sm:$0xff]  ;;  %v143_v19 = vld [vmem:[%s1164_s3 + $0x28] sm:$0xff] }
   0x6   :  { %693 = vmatprep.subr.bf16.mxu0 %v692_v5  ;;  %v724_v17 = vpack.c.bf16 %v141_v16, %v140_v14  ;;  %v46_v21 = vld [vmem:[%s1162_s1 + $0x40] sm:$0xff]  ;;  %v47_v22 = vld [vmem:[%s1162_s1 + $0x48] sm:$0xff] }
   0x7   :  { %721 = vmatprep.subr.bf16.mxu1 %v720_v15 }
   0x8   :  { %723 = vmatpush3.bf16.msra.mxu1 %v720_v15 }
   0x9   :  { %695 = vmatpush3.bf16.msra.mxu0 %v692_v5 }
   0xa   :  { %697 = vmatprep.subr.bf16.mxu0 %v696_v8 }
   0xb   :  { %17 = vsyncpa [#allocation5], 0  ;;  %725 = vmatprep.subr.bf16.mxu1 %v724_v17  ;;  %v728_v23 = vpack.c.bf16 %v143_v19, %v142_v18  ;;  %v144_v24 = vld [vmem:[%s1164_s3 + $0x30] sm:$0xff]  ;;  %v145_v25 = vld [vmem:[%s1164_s3 + $0x38] sm:$0xff]  ;;  %v704_v26 = vpack.c.bf16 %v47_v22, %v46_v21  ;;  %s868_s16 = smov [#allocation4]  }
   0xc   :  { %v48_v27 = vld [vmem:[%s1162_s1 + $0x50] sm:$0xff]  ;;  %v49_v28 = vld [vmem:[%s1162_s1 + $0x58] sm:$0xff]  ;;  %727 = vmatpush3.bf16.msra.mxu1 %v724_v17  ;;  %v732_v29 = vpack.c.bf16 %v145_v25, %v144_v24  ;;  %v146_v30 = vld [vmem:[%s1164_s3 + $0x40] sm:$0xff]  ;;  %s457_s17 = sshll.u32 %s868_s16, 4  ;;  %s458_s17 = int_to_ptr.vmem [resolvable:$true] %s457_s17 }
   0xd   :  { %699 = vmatpush3.bf16.msra.mxu0 %v696_v8  ;;  %729 = vmatprep.subr.bf16.mxu1 %v728_v23  ;;  %v147_v31 = vld [vmem:[%s1164_s3 + $0x48] sm:$0xff]  ;;  %v708_v32 = vpack.c.bf16 %v49_v28, %v48_v27  ;;  %v50_v33 = vld [vmem:[%s1162_s1 + $0x60] sm:$0xff]  ;;  %v148_v36 = vld [vmem:[%s1164_s3 + $0x50] sm:$0xff]  ;;  %p825_p1 = scmp.lt.s32.totalorder %s458_s17, %s458_s17 }
   0xe   :  { %701 = vmatprep.subr.bf16.mxu0 %v700_v20  ;;  %v51_v34 = vld [vmem:[%s1162_s1 + $0x68] sm:$0xff]  ;;  %v736_v35 = vpack.c.bf16 %v147_v31, %v146_v30  ;;  %v149_v37 = vld [vmem:[%s1164_s3 + $0x58] sm:$0xff]  ;;  %v52_v39 = vld [vmem:[%s1162_s1 + $0x70] sm:$0xff] }
   0xf   :  { %v712_v38 = vpack.c.bf16 %v51_v34, %v50_v33  ;;  %v53_v40 = vld [vmem:[%s1162_s1 + $0x78] sm:$0xff]  ;;  %v740_v41 = vpack.c.bf16 %v149_v37, %v148_v36  ;;  %v150_v42 = vld [vmem:[%s1164_s3 + $0x60] sm:$0xff]  ;;  %v151_v43 = vld [vmem:[%s1164_s3 + $0x68] sm:$0xff] }
  0x10   :  { %731 = vmatpush3.bf16.msra.mxu1 %v728_v23  ;;  %v716_v44 = vpack.c.bf16 %v53_v40, %v52_v39  ;;  %v744_v45 = vpack.c.bf16 %v151_v43, %v150_v42  ;;  %v37_v46 = vld [vmem:[%s1161_s0 + $0x8] sm:$0xff]  ;;  %v152_v47 = vld [vmem:[%s1164_s3 + $0x70] sm:$0xff]  ;;  %v153_v48 = vld [vmem:[%s1164_s3 + $0x78] sm:$0xff] }
  0x11   :  { %703 = vmatpush3.bf16.msra.mxu0 %v700_v20  ;;  %733 = vmatprep.subr.bf16.mxu1 %v732_v29  ;;  %v748_v49 = vpack.c.bf16 %v153_v48, %v152_v47  ;;  %v238_v50 = vld [vmem:[%s1166_s5] sm:$0xff]  ;;  %v239_v51 = vld [vmem:[%s1166_s5 + $0x8] sm:$0xff]  ;;  %v240_v52 = vld [vmem:[%s1166_s5 + $0x10] sm:$0xff] }
  0x12   :  { %705 = vmatprep.subr.bf16.mxu0 %v704_v26  ;;  %v752_v53 = vpack.c.bf16 %v239_v51, %v238_v50  ;;  %v241_v54 = vld [vmem:[%s1166_s5 + $0x18] sm:$0xff]  ;;  %v242_v56 = vld [vmem:[%s1166_s5 + $0x20] sm:$0xff]  ;;  %v243_v57 = vld [vmem:[%s1166_s5 + $0x28] sm:$0xff] }
  0x13   :  { %v756_v55 = vpack.c.bf16 %v241_v54, %v240_v52  ;;  %v760_v58 = vpack.c.bf16 %v243_v57, %v242_v56  ;;  %v244_v59 = vld [vmem:[%s1166_s5 + $0x30] sm:$0xff]  ;;  %v245_v60 = vld [vmem:[%s1166_s5 + $0x38] sm:$0xff]  ;;  %v246_v62 = vld [vmem:[%s1166_s5 + $0x40] sm:$0xff] }
  0x14   :  { %735 = vmatpush3.bf16.msra.mxu1 %v732_v29  ;;  %v764_v61 = vpack.c.bf16 %v245_v60, %v244_v59  ;;  %v247_v63 = vld [vmem:[%s1166_s5 + $0x48] sm:$0xff]  ;;  %v248_v1 = vld [vmem:[%s1166_s5 + $0x50] sm:$0xff]  ;;  %v249_v2 = vld [vmem:[%s1166_s5 + $0x58] sm:$0xff] }
  0x15   :  { %707 = vmatpush3.bf16.msra.mxu0 %v704_v26  ;;  %737 = vmatprep.subr.bf16.mxu1 %v736_v35  ;;  %v768_v0 = vpack.c.bf16 %v247_v63, %v246_v62  ;;  %v772_v3 = vpack.c.bf16 %v249_v2, %v248_v1  ;;  %v250_v4 = vld [vmem:[%s1166_s5 + $0x60] sm:$0xff]  ;;  %v251_v5 = vld [vmem:[%s1166_s5 + $0x68] sm:$0xff]  ;;  %v252_v14 = vld [vmem:[%s1166_s5 + $0x70] sm:$0xff] }
  0x16   :  { %709 = vmatprep.subr.bf16.mxu0 %v708_v32  ;;  %v776_v6 = vpack.c.bf16 %v251_v5, %v250_v4  ;;  %v472_v7 = vld [vmem:[%s1163_s2] ss:$0 sm:$0xff]  ;;  %v253_v15 = vld [vmem:[%s1166_s5 + $0x78] sm:$0xff]  ;;  %v341_v18 = vld [vmem:[%s1168_s7 + $0x8] sm:$0xff] }
  0x17   :  { %v780_v16 = vpack.c.bf16 %v253_v15, %v252_v14  ;;  %v340_v17 = vld [vmem:[%s1168_s7] sm:$0xff]  ;;  %v342_v19 = vld [vmem:[%s1168_s7 + $0x10] sm:$0xff]  ;;  %v343_v21 = vld [vmem:[%s1168_s7 + $0x18] sm:$0xff] }
  0x18   :  { %739 = vmatpush3.bf16.msra.mxu1 %v736_v35  ;;  %v784_v20 = vpack.c.bf16 %v341_v18, %v340_v17  ;;  %v788_v22 = vpack.c.bf16 %v343_v21, %v342_v19  ;;  %v344_v23 = vld [vmem:[%s1168_s7 + $0x20] sm:$0xff]  ;;  %v345_v24 = vld [vmem:[%s1168_s7 + $0x28] sm:$0xff]  ;;  %v346_v26 = vld [vmem:[%s1168_s7 + $0x30] sm:$0xff] }
  0x19   :  { %711 = vmatpush3.bf16.msra.mxu0 %v708_v32  ;;  %741 = vmatprep.subr.bf16.mxu1 %v740_v41  ;;  %v792_v25 = vpack.c.bf16 %v345_v24, %v344_v23  ;;  %v347_v27 = vld [vmem:[%s1168_s7 + $0x38] sm:$0xff]  ;;  %v348_v29 = vld [vmem:[%s1168_s7 + $0x40] sm:$0xff]  ;;  %v349_v30 = vld [vmem:[%s1168_s7 + $0x48] sm:$0xff] }
  0x1a   :  { %713 = vmatprep.subr.bf16.mxu0 %v712_v38  ;;  %v796_v28 = vpack.c.bf16 %v347_v27, %v346_v26  ;;  %v800_v31 = vpack.c.bf16 %v349_v30, %v348_v29  ;;  %v350_v32 = vld [vmem:[%s1168_s7 + $0x50] sm:$0xff]  ;;  %v351_v33 = vld [vmem:[%s1168_s7 + $0x58] sm:$0xff]  ;;  %v352_v35 = vld [vmem:[%s1168_s7 + $0x60] sm:$0xff] }
  0x1b   :  { %v804_v34 = vpack.c.bf16 %v351_v33, %v350_v32  ;;  %v353_v36 = vld [vmem:[%s1168_s7 + $0x68] sm:$0xff]  ;;  %v474_v48 = vld [vmem:[%s1167_s6] ss:$0 sm:$0xff] }
  0x1c   :  { %743 = vmatpush3.bf16.msra.mxu1 %v740_v41  ;;  %v808_v37 = vpack.c.bf16 %v353_v36, %v352_v35 }
  0x1d   :  { %715 = vmatpush3.bf16.msra.mxu0 %v712_v38  ;;  %745 = vmatprep.subr.bf16.mxu1 %v744_v45  ;;  %v473_v38 = vld [vmem:[%s1165_s4] ss:$0 sm:$0xff] }
  0x1e   :  { %717 = vmatprep.subr.bf16.mxu0 %v716_v44 }
  0x20   :  { %747 = vmatpush3.bf16.msra.mxu1 %v744_v45  ;;  %v354_v45 = vld [vmem:[%s1168_s7 + $0x70] sm:$0xff] }
  0x21   :  { %719 = vmatpush3.bf16.msra.mxu0 %v716_v44  ;;  %749 = vmatprep.subr.bf16.mxu1 %v748_v49 }
  0x22   :  { %753 = vmatprep.subr.bf16.mxu0 %v752_v53 }
  0x24   :  { %581 = vmatmul.mubr.f32.vlgmr.msra.gmra.mrb[0].mxu0 %v37_v46  ;;  %751 = vmatpush3.bf16.msra.mxu1 %v748_v49  ;;  %v355_v46 = vld [vmem:[%s1168_s7 + $0x78] sm:$0xff]  ;;  %s820_s7 = scalar_lea.vmem %s458_s17, 256 }
  0x25   :  { %755 = vmatpush3.bf16.msra.mxu0 %v752_v53  ;;  %785 = vmatprep.subr.bf16.mxu1 %v784_v20  ;;  %v812_v47 = vpack.c.bf16 %v355_v46, %v354_v45  ;;  %p821_p0 = scmp.ne.s32.totalorder %s458_s17, %s820_s7  ;;  %p826_p2 = scmp.lt.s32.totalorder %s820_s7, %s820_s7 }
  0x26   :  { %757 = vmatprep.subr.bf16.mxu0 %v756_v55 }
  0x27   :  { %p827_p3 = por %p826_p2, %p825_p1 }
  0x29   :  { %759 = vmatpush3.bf16.msra.mxu0 %v756_v55  ;;  %p828_p4 = pnand %p827_p3, %p821_p0 }
  0x2a   :  { %761 = vmatprep.subr.bf16.mxu0 %v760_v58 }
  0x2d   :  { %763 = vmatpush3.bf16.msra.mxu0 %v760_v58 }
  0x2e   :  { %765 = vmatprep.subr.bf16.mxu0 %v764_v61 }
  0x31   :  { %767 = vmatpush3.bf16.msra.mxu0 %v764_v61 }
  0x32   :  { %769 = vmatprep.subr.bf16.mxu0 %v768_v0 }
  0x35   :  { %771 = vmatpush3.bf16.msra.mxu0 %v768_v0 }
  0x36   :  { %773 = vmatprep.subr.bf16.mxu0 %v772_v3 }
  0x39   :  { %775 = vmatpush3.bf16.msra.mxu0 %v772_v3 }
  0x3a   :  { %777 = vmatprep.subr.bf16.mxu0 %v776_v6 }
  0x3d   :  { %779 = vmatpush3.bf16.msra.mxu0 %v776_v6 }
  0x3e   :  { %781 = vmatprep.subr.bf16.mxu0 %v780_v16 }
  0x41   :  { %783 = vmatpush3.bf16.msra.mxu0 %v780_v16 }
  0xf7   :  { %v582_v8 = vpop.f32.mrb[0].mxu0 }
  0xf8   :  { %v133_v9 = vadd.f32 %v582_v8, %v472_v7  ;;  %v127_v10 = vpop.f32.mrb[1].mxu0 }
  0xf9   :  { %v128_v11 = vadd.f32 %v472_v7, %v127_v10 }
  0xfa   :  { %v137_v13 = vmax.f32 %v133_v9, 0.0 }
  0xfb   :  { %v136_v12 = vmax.f32 %v128_v11, 0.0 }
  0xfd   :  { %615 = vmatprep.mubr.f32.mxu1 %v136_v12 }
  0xfe   :  { %616 = vmatmul.mubr.f32.vlgmr.msra.gmra.mrb[0].mxu1 %v137_v13 }
  0xff   :  { %787 = vmatpush3.bf16.msra.mxu1 %v784_v20 }
 0x100   :  { %789 = vmatprep.subr.bf16.mxu1 %v788_v22 }
 0x103   :  { %791 = vmatpush3.bf16.msra.mxu1 %v788_v22 }
 0x104   :  { %793 = vmatprep.subr.bf16.mxu1 %v792_v25 }
 0x107   :  { %795 = vmatpush3.bf16.msra.mxu1 %v792_v25 }
 0x108   :  { %797 = vmatprep.subr.bf16.mxu1 %v796_v28 }
 0x10b   :  { %799 = vmatpush3.bf16.msra.mxu1 %v796_v28 }
 0x10c   :  { %801 = vmatprep.subr.bf16.mxu1 %v800_v31 }
 0x10f   :  { %803 = vmatpush3.bf16.msra.mxu1 %v800_v31 }
 0x110   :  { %805 = vmatprep.subr.bf16.mxu1 %v804_v34 }
 0x113   :  { %807 = vmatpush3.bf16.msra.mxu1 %v804_v34 }
 0x114   :  { %809 = vmatprep.subr.bf16.mxu1 %v808_v37 }
 0x117   :  { %811 = vmatpush3.bf16.msra.mxu1 %v808_v37 }
 0x118   :  { %813 = vmatprep.subr.bf16.mxu1 %v812_v47 }
 0x11b   :  { %815 = vmatpush3.bf16.msra.mxu1 %v812_v47 }
 0x1d1   :  { %v617_v39 = vpop.f32.mrb[0].mxu1 }
 0x1d2   :  { %v233_v40 = vadd.f32 %v617_v39, %v473_v38  ;;  %v227_v41 = vpop.f32.mrb[1].mxu1 }
 0x1d3   :  { %v228_v42 = vadd.f32 %v473_v38, %v227_v41 }
 0x1d4   :  { %v237_v44 = vmax.f32 %v233_v40, 0.0 }
 0x1d5   :  { %v236_v43 = vmax.f32 %v228_v42, 0.0 }
 0x1d7   :  { %650 = vmatprep.mubr.f32.mxu0 %v236_v43 }
 0x1d8   :  { %651 = vmatmul.mubr.f32.vlgmr.msra.gmra.mrb[2].mxu0 %v237_v44 }
 0x2ab   :  { %v652_v49 = vpop.f32.mrb[2].mxu0 }
 0x2ac   :  { %v333_v50 = vadd.f32 %v652_v49, %v474_v48  ;;  %v327_v51 = vpop.f32.mrb[3].mxu0 }
 0x2ad   :  { %v328_v52 = vadd.f32 %v474_v48, %v327_v51 }
 0x2ae   :  { %v337_v53 = vmax.f32 %v333_v50, 0.0 }
 0x2af   :  { %v336_v54 = vmax.f32 %v328_v52, 0.0 }
 0x2b0   :  { %339 = vst [vmem:[#allocation4 + $0x8] sm:$0xff] %v337_v53 }
 0x2b1   :  { %338 = vst [vmem:[#allocation4] sm:$0xff] %v336_v54  ;;  %685 = vmatprep.mubr.f32.mxu1 %v336_v54 }
 0x2b2   :  { %686 = vmatmul.mubr.f32.vlgmr.msra.gmra.mrb[2].mxu1 %v337_v53 }
 0x2b3   :  { %831 = shalt.err (!%p828_p4)
}
 0x2b4   :  { %s832_s19 = scalar_lea.hbm %s1171_s10, 256 }
 0x2b5   :  { %p833_p5 = scmp.ne.s32.totalorder %s1171_s10, %s832_s19  ;;  %p836_p6 = scmp.lt.u32.totalorder %s832_s19, %s1171_s10 }
 0x2b7   :  { %p838_p7 = pnand %p836_p6, %p833_p5 }
 0x2b9   :  { %841 = shalt.err (!%p838_p7)
}
 0x2ba   :  { %s869_s0 = smov 128   ;;  %s870_s24 = smov 8   ;;  %v475_v55 = vld [vmem:[%s1169_s8] ss:$0 sm:$0xff] }
 0x2bb   :  { %463 = dma.vmem_to_hbm [thread:$0]  %s458_s17, 256, %s1171_s10, [#allocation5], %s869_s0, %s869_s0, %s870_s24  }
 0x2bc   :  { %s871_s28 = smov [#allocation2]  }
 0x2bd   :  { %s445_s2 = sshll.u32 %s871_s28, 4  ;;  %s446_s2 = int_to_ptr.vmem [resolvable:$true] %s445_s2 }
 0x2be   :  { %s842_s29 = scalar_lea.vmem %s446_s2, 256  ;;  %p847_p9 = scmp.lt.s32.totalorder %s446_s2, %s446_s2 }
 0x2bf   :  { %p843_p8 = scmp.ne.s32.totalorder %s446_s2, %s842_s29  ;;  %p848_p10 = scmp.lt.s32.totalorder %s842_s29, %s842_s29 }
 0x2c1   :  { %p849_p11 = por %p848_p10, %p847_p9 }
 0x2c3   :  { %p850_p12 = pnand %p849_p11, %p843_p8 }
 0x385   :  { %v687_v56 = vpop.f32.mrb[2].mxu1 }
 0x386   :  { %v435_v57 = vadd.f32 %v687_v56, %v475_v55  ;;  %v429_v58 = vpop.f32.mrb[3].mxu1 }
 0x387   :  { %v430_v59 = vadd.f32 %v475_v55, %v429_v58 }
 0x388   :  { %439 = vst [vmem:[#allocation2 + $0x8] sm:$0xff] %v435_v57 }
 0x389   :  { %438 = vst [vmem:[#allocation2] sm:$0xff] %v430_v59 }
 0x38a   :  { %853 = shalt.err (!%p850_p12)
}
 0x38b   :  { %s854_s8 = scalar_lea.hbm %s1170_s9, 256 }
 0x38c   :  { %p855_p13 = scmp.ne.s32.totalorder %s1170_s9, %s854_s8  ;;  %p858_p0 = scmp.lt.u32.totalorder %s854_s8, %s1170_s9 }
 0x38e   :  { %p860_p1 = pnand %p858_p0, %p855_p13 }
 0x390   :  { %863 = shalt.err (!%p860_p1)
}
 0x391   :  { %451 = dma.vmem_to_hbm [thread:$0]  %s446_s2, 256, %s1170_s9, [#allocation3], %s869_s0, %s869_s0, %s870_s24  }
 0x392   :  { %864 = dma.done.wait [#allocation3], 256  }
 0x393   :  { %865 = vsyncadd [#allocation3], 4294967040 }
 0x394   :  { %866 = dma.done.wait [#allocation5], 256  }
 0x395   :  { %867 = vsyncadd [#allocation5], 4294967040 }
 0x396   :  { %470 = vsyncpa [#allocation3], 1 }
 0x397   :  { %471 = vsyncpa [#allocation5], 1 }

</bundles_post_ra>
